<compile_context>
chip_gen: v6e
topology: v6e:2x2x1
jax: 0.10.0
libtpu: 0.0.40
codegen_flags: <defaults>
</compile_context>

<pallas_src>
import functools

import jax
import jax.numpy as jnp
from jax import lax
from jax.experimental import pallas as pl
from jax.experimental.pallas import tpu as pltpu

COLS = 1024            # lane-dense width (multiple of 128) -> wide unmasked stores
MAX_BLOCK_ROWS = 512   # 512 x 1024 x 4 B = 2 MiB per block buffer (VMEM-safe on v7x)


def _dropout_kernel(p, threshold24, block_rows, seed_ref, x_ref, o_ref):
    """Dropout on one (block_rows, COLS) tile.

    Random bits come from a stateless hash of the global element index and the
    seed, so every grid step is independent ("parallel" grid, no TPU stateful
    PRNG needed).  drop = uniform(0,1) < p  ->  out = x * where(drop, 0, 1/(1-p)).
    """
    shape = x_ref.shape
    # Global linear index of every element in this tile (int32 counter).
    row = lax.broadcasted_iota(jnp.int32, shape, 0)
    col = lax.broadcasted_iota(jnp.int32, shape, 1)
    base = pl.program_id(0) * block_rows
    g = ((base + row) * shape[1] + col).astype(jnp.uint32)

    # Seeded lowbias32-style integer mixer (full avalanche over sequential counters).
    key = seed_ref[0].astype(jnp.uint32) * jnp.uint32(0x9E3779B9)
    v = g + key
    v = v ^ (v >> jnp.uint32(16))
    v = v * jnp.uint32(0x7FEB352D)
    v = v ^ (v >> jnp.uint32(15))
    v = v * jnp.uint32(0x846CA68B)
    v = v ^ (v >> jnp.uint32(16))

    # 24 random bits -> non-negative int32, single signed threshold compare.
    r24 = (v >> jnp.uint32(8)).astype(jnp.int32)
    drop = r24 < jnp.int32(threshold24)

    scale = jnp.float32(1.0) / jnp.float32(1.0 - p)   # inf if p == 1 (matches torch nan/0 edge)
    keep = jnp.where(drop, jnp.float32(0.0), scale)
    o_ref[...] = (x_ref[...].astype(jnp.float32) * keep).astype(o_ref.dtype)


def my_dropout(x, p, *, training=True, seed=0):
    """JAX/Pallas equivalent of MyDropout.forward."""
    assert 0.0 <= p <= 1.0
    if (not training) or p <= 0.001:
        return x  # identity path, exactly as in the PyTorch module

    orig_shape = x.shape
    orig_dtype = x.dtype
    total = x.size

    # Lane-dense 2-D layout: [rows, COLS], tiled along rows.
    rows = pl.cdiv(total, COLS)
    if rows <= MAX_BLOCK_ROWS:
        block_rows = rows                      # one whole-array block, grid of 1
        padded_rows = rows
    else:
        block_rows = MAX_BLOCK_ROWS            # 2 MiB f32 tile, multiple of 8 sublanes
        padded_rows = ((rows + block_rows - 1) // block_rows) * block_rows
    padded_total = padded_rows * COLS
    grid = (padded_rows // block_rows,)

    x_flat = jnp.ravel(x)
    needs_pad = padded_total != total
    if needs_pad:
        x_flat = jnp.pad(x_flat, (0, padded_total - total))
    x2d = x_flat.reshape(padded_rows, COLS)

    # Integer dropout threshold on 24 random bits: drop iff r24 < p * 2^24.
    threshold24 = min(int(round(p * float(1 << 24))), 1 << 24)
    seed_arr = jnp.array([seed], dtype=jnp.int32)

    out2d = pl.pallas_call(
        functools.partial(_dropout_kernel, float(p), threshold24, block_rows),
        out_shape=jax.ShapeDtypeStruct((padded_rows, COLS), orig_dtype),
        grid_spec=pltpu.PrefetchScalarGridSpec(
            num_scalar_prefetch=1,
            grid=grid,
            in_specs=[pl.BlockSpec((block_rows, COLS), lambda i, seed: (i, 0))],
            out_specs=pl.BlockSpec((block_rows, COLS), lambda i, seed: (i, 0)),
        ),
        compiler_params=pltpu.CompilerParams(
            dimension_semantics=("parallel",),         # stateless RNG -> order-independent
            vmem_limit_bytes=32 * 1024 * 1024,         # explicit, safe on v5e/v6e/v7x
        ),
    )(seed_arr, x2d)

    if needs_pad:
        out = out2d.reshape(-1)[:total].reshape(orig_shape)
    else:
        out = out2d.reshape(orig_shape)                # free reshape, no copy/slice
    return out


if __name__ == "__main__":
    key = jax.random.PRNGKey(0)
    # NCHW activation shape consistent with the module: [N, C, H, W] = [2, 4, 16, 16]
    x = jax.random.normal(key, (2, 4, 16, 16), dtype=jnp.float32)
    p = 0.3

    # Training mode: dropout applied in the Pallas kernel.
    y_train = my_dropout(x, p, training=True, seed=42)
    y_train = jax.block_until_ready(y_train)

    # Eval mode: identity (matches the PyTorch module when self.training is False).
    y_eval = my_dropout(x, p, training=False)
    y_eval = jax.block_until_ready(y_eval)

    # Sanity checks: surviving elements are exactly x / (1 - p), dropped are 0.
    scale = 1.0 / (1.0 - p)
    kept = y_train != 0.0          # x ~ N(0,1): exact zeros have measure zero
    assert y_train.shape == x.shape and y_train.dtype == x.dtype
    assert jnp.allclose(jnp.where(kept, y_train, 0.0),
                        jnp.where(kept, x * scale, 0.0), rtol=1e-5, atol=1e-5)
    assert jnp.allclose(y_eval, x)
    drop_frac = 1.0 - (jnp.sum(kept) / x.size)
    assert 0.15 < float(drop_frac) < 0.45  # ~p fraction dropped (p = 0.3)

    print("KERNEL_OK")
</pallas_src>

<mosaic_0001>
module attributes {stable_mosaic.version = 11 : i64} {
  func.func @_dropout_kernel(%arg0: i32, %arg1: memref<1xi32, #tpu.memory_space<smem>>, %arg2: memref<2x1024xf32, #tpu.memory_space<vmem>>, %arg3: memref<2x1024xf32, #tpu.memory_space<vmem>>) attributes {dimension_semantics = [#tpu.dimension_semantics<parallel>], iteration_bounds = array<i64: 1>, scalar_prefetch = 1 : i64, scratch_operands = 0 : i64, tpu.core_type = #tpu.core_type<tc>, window_params = [{transform_indices = @transform_0, window_bounds = array<i64: 2, 1024>}, {transform_indices = @transform_1, window_bounds = array<i64: 2, 1024>}]} {
    %0 = tpu.iota {dimensions = array<i32: 0>} : vector<2x1024xi32>
    %1 = tpu.iota {dimensions = array<i32: 1>} : vector<2x1024xi32>
    %c2_i32 = arith.constant 2 : i32
    %2 = arith.muli %arg0, %c2_i32 : i32
    %3 = vector.broadcast %2 : i32 to vector<2x1024xi32>
    %4 = arith.addi %3, %0 : vector<2x1024xi32>
    %c1024_i32 = arith.constant 1024 : i32
    %5 = vector.broadcast %c1024_i32 : i32 to vector<2x1024xi32>
    %6 = arith.muli %4, %5 : vector<2x1024xi32>
    %7 = arith.addi %6, %1 : vector<2x1024xi32>
    %c0 = arith.constant 0 : index
    %8 = memref.load %arg1[%c0] : memref<1xi32, #tpu.memory_space<smem>>
    %c-1640531527_i32 = arith.constant -1640531527 : i32
    %9 = arith.muli %8, %c-1640531527_i32 : i32
    %10 = vector.broadcast %9 : i32 to vector<2x1024xi32>
    %11 = arith.addi %7, %10 : vector<2x1024xi32>
    %c16_i32 = arith.constant 16 : i32
    %12 = vector.broadcast %c16_i32 : i32 to vector<2x1024xi32>
    %13 = arith.shrui %11, %12 : vector<2x1024xi32>
    %14 = arith.xori %11, %13 : vector<2x1024xi32>
    %c2146121005_i32 = arith.constant 2146121005 : i32
    %15 = vector.broadcast %c2146121005_i32 : i32 to vector<2x1024xi32>
    %16 = arith.muli %14, %15 : vector<2x1024xi32>
    %c15_i32 = arith.constant 15 : i32
    %17 = vector.broadcast %c15_i32 : i32 to vector<2x1024xi32>
    %18 = arith.shrui %16, %17 : vector<2x1024xi32>
    %19 = arith.xori %16, %18 : vector<2x1024xi32>
    %c-2073254261_i32 = arith.constant -2073254261 : i32
    %20 = vector.broadcast %c-2073254261_i32 : i32 to vector<2x1024xi32>
    %21 = arith.muli %19, %20 : vector<2x1024xi32>
    %c16_i32_0 = arith.constant 16 : i32
    %22 = vector.broadcast %c16_i32_0 : i32 to vector<2x1024xi32>
    %23 = arith.shrui %21, %22 : vector<2x1024xi32>
    %24 = arith.xori %21, %23 : vector<2x1024xi32>
    %c8_i32 = arith.constant 8 : i32
    %25 = vector.broadcast %c8_i32 : i32 to vector<2x1024xi32>
    %26 = arith.shrui %24, %25 : vector<2x1024xi32>
    %c5033165_i32 = arith.constant 5033165 : i32
    %27 = vector.broadcast %c5033165_i32 : i32 to vector<2x1024xi32>
    %28 = arith.cmpi slt, %26, %27 : vector<2x1024xi32>
    %cst = arith.constant 1.000000e+00 : f32
    %cst_1 = arith.constant 0.699999988 : f32
    %29 = arith.divf %cst, %cst_1 : f32
    %cst_2 = arith.constant 0.000000e+00 : f32
    %30 = vector.broadcast %cst_2 : f32 to vector<2x1024xf32>
    %31 = vector.broadcast %29 : f32 to vector<2x1024xf32>
    %32 = arith.select %28, %30, %31 : vector<2x1024xi1>, vector<2x1024xf32>
    %c0_3 = arith.constant 0 : index
    %c0_4 = arith.constant 0 : index
    %33 = vector.load %arg2[%c0_3, %c0_4] : memref<2x1024xf32, #tpu.memory_space<vmem>>, vector<2x1024xf32>
    %34 = arith.mulf %33, %32 : vector<2x1024xf32>
    %c0_5 = arith.constant 0 : index
    %c0_6 = arith.constant 0 : index
    %35 = vector.load %arg3[%c0_5, %c0_6] : memref<2x1024xf32, #tpu.memory_space<vmem>>, vector<2x1024xf32>
    tpu.vector_store %arg3[%c0_5, %c0_6], %34 {strides = array<i32>} : memref<2x1024xf32, #tpu.memory_space<vmem>>, vector<2x1024xf32>,
    return
  }
  func.func @transform_0(%arg0: i32, %arg1: memref<1xi32, #tpu.memory_space<smem>>) -> (i32, i32) {
    %c0_i32 = arith.constant 0 : i32
    %c0_i32_0 = arith.constant 0 : i32
    return %arg0, %c0_i32 : i32, i32
  }
  func.func @transform_1(%arg0: i32, %arg1: memref<1xi32, #tpu.memory_space<smem>>) -> (i32, i32) {
    %c0_i32 = arith.constant 0 : i32
    %c0_i32_0 = arith.constant 0 : i32
    return %arg0, %c0_i32 : i32, i32
  }
}

</mosaic_0001>

<bundles_post_ra>
// kernel: tpu_custom_call.1
= control target key start
LH: loop header
LB: loop body
LE: loop exit
PB: predicated region body
PF: predicated region fallthrough
CT: control target
= control target key end

     0   :  { %8 = vsyncpa [#allocation5], 0  ;;  %s292_s0 = inlined_call_operand.<no memory space> [shape: s32[1], index: 0, kind: input, shape index: {}]   ;;  %s293_s1 = inlined_call_operand.hbm [shape: f32[2,1024], index: 1, kind: input, shape index: {}]   ;;  %s294_s2 = inlined_call_operand.hbm [shape: f32[2,1024], index: 2, kind: output, shape index: {}]  }
   0x1   :  { %9 = vsyncpa [#allocation6], 0  ;;  %s258_s9 = smov [#allocation4]  }
   0x2   :  { %s16_s10 = sshll.u32 %s258_s9, 4  ;;  %s17_s10 = int_to_ptr.vmem [resolvable:$true] %s16_s10 }
   0x3   :  { %s222_s11 = scalar_lea.vmem %s17_s10, 256  ;;  %p227_p1 = scmp.lt.s32.totalorder %s17_s10, %s17_s10 }
   0x4   :  { %p223_p0 = scmp.ne.s32.totalorder %s17_s10, %s222_s11  ;;  %p228_p2 = scmp.lt.s32.totalorder %s222_s11, %s222_s11 }
   0x6   :  { %p229_p3 = por %p228_p2, %p227_p1 }
   0x8   :  { %p230_p4 = pnand %p229_p3, %p223_p0 }
   0xa   :  { %233 = shalt.err (!%p230_p4)
}
   0xb   :  { %19 = dma.hbm_to_vmem [thread:$0]  %s293_s1, 256, %s17_s10, [#allocation5]  }
   0xc   :  { %254 = dma.done.wait [#allocation5], 256  }
   0xd   :  { %255 = vsyncadd [#allocation5], 4294967040  ;;  %v23_v0 = vlaneseq  ;;  %s47_s16 = smul.u32 2654435769, %s292_s0  ;;  %v259_v3 = vmov 1983009808  }
   0xe   :  { %v158_v4 = vunpack.c.l.s4 %v259_v3  ;;  %s261_s0 = smov [#allocation7]  }
   0xf   :  { %v24_v1 = vshrl.u32 %v23_v0, 7  ;;  %v26_v2 = vand.u32 127, %v23_v0  ;;  %v48_v9 = vstv %s47_s16  ;;  %s201_s1 = sshll.u32 %s261_s0, 4  ;;  %s202_s1 = int_to_ptr.vmem [resolvable:$true] %s201_s1 }
  0x10   :  { %v159_v17 = vunpack.c.0.s8 %v158_v4  ;;  %s234_s17 = scalar_lea.vmem %s202_s1, 256  ;;  %p239_p6 = scmp.lt.s32.totalorder %s202_s1, %s202_s1 }
  0x11   :  { %v27_v5 = vadd.s32 128, %v26_v2  ;;  %v28_v6 = vadd.s32 256, %v26_v2  ;;  %v29_v7 = vadd.s32 384, %v26_v2  ;;  %v37_v8 = vmul.u32 1024, %v24_v1  ;;  %p235_p5 = scmp.ne.s32.totalorder %s202_s1, %s234_s17  ;;  %p240_p7 = scmp.lt.s32.totalorder %s234_s17, %s234_s17 }
  0x12   :  { %v30_v10 = vadd.s32 512, %v26_v2  ;;  %v31_v11 = vadd.s32 640, %v26_v2  ;;  %v32_v12 = vadd.s32 768, %v26_v2  ;;  %v33_v18 = vadd.s32 896, %v26_v2 }
  0x13   :  { %v38_v13 = vadd.s32 %v37_v8, %v26_v2  ;;  %v39_v14 = vadd.s32 %v37_v8, %v27_v5  ;;  %v40_v15 = vadd.s32 %v37_v8, %v28_v6  ;;  %v41_v16 = vadd.s32 %v37_v8, %v29_v7  ;;  %p241_p8 = por %p240_p7, %p239_p6 }
  0x14   :  { %v42_v19 = vadd.s32 %v37_v8, %v30_v10  ;;  %v43_v20 = vadd.s32 %v37_v8, %v31_v11  ;;  %v44_v25 = vadd.s32 %v37_v8, %v32_v12  ;;  %v45_v26 = vadd.s32 %v37_v8, %v33_v18 }
  0x15   :  { %v49_v21 = vadd.s32 %v48_v9, %v38_v13  ;;  %v50_v22 = vadd.s32 %v48_v9, %v39_v14  ;;  %v51_v23 = vadd.s32 %v48_v9, %v40_v15  ;;  %v52_v24 = vadd.s32 %v48_v9, %v41_v16  ;;  %p242_p9 = pnand %p241_p8, %p235_p5 }
  0x16   :  { %v53_v27 = vadd.s32 %v48_v9, %v42_v19  ;;  %v54_v28 = vadd.s32 %v48_v9, %v43_v20  ;;  %v55_v33 = vadd.s32 %v48_v9, %v44_v25  ;;  %v56_v34 = vadd.s32 %v48_v9, %v45_v26 }
  0x17   :  { %v57_v29 = vshrl.u32 %v49_v21, 16  ;;  %v58_v30 = vshrl.u32 %v50_v22, 16  ;;  %v59_v31 = vshrl.u32 %v51_v23, 16  ;;  %v60_v32 = vshrl.u32 %v52_v24, 16 }
  0x18   :  { %v61_v35 = vshrl.u32 %v53_v27, 16  ;;  %v62_v36 = vshrl.u32 %v54_v28, 16  ;;  %v63_v41 = vshrl.u32 %v55_v33, 16  ;;  %v64_v42 = vshrl.u32 %v56_v34, 16 }
  0x19   :  { %v65_v37 = vxor.u32 %v57_v29, %v49_v21  ;;  %v66_v38 = vxor.u32 %v58_v30, %v50_v22  ;;  %v67_v39 = vxor.u32 %v59_v31, %v51_v23  ;;  %v68_v40 = vxor.u32 %v60_v32, %v52_v24 }
  0x1a   :  { %v69_v43 = vxor.u32 %v61_v35, %v53_v27  ;;  %v70_v44 = vxor.u32 %v62_v36, %v54_v28  ;;  %v283_v47 = vsub.s32 %v159_v17, %v24_v1  ;;  %v71_v50 = vxor.u32 %v63_v41, %v55_v33 }
  0x1b   :  { %v73_v45 = vmul.u32 2146121005, %v65_v37  ;;  %v74_v46 = vmul.u32 2146121005, %v66_v38  ;;  %v72_v51 = vxor.u32 %v64_v42, %v56_v34  ;;  %v260_v38 = vmov 1.4285715  }
  0x1c   :  { %v75_v48 = vmul.u32 2146121005, %v67_v39  ;;  %v76_v49 = vmul.u32 2146121005, %v68_v40 }
  0x1d   :  { %v81_v52 = vshrl.u32 %v73_v45, 15  ;;  %v82_v53 = vshrl.u32 %v74_v46, 15  ;;  %v77_v54 = vmul.u32 2146121005, %v69_v43  ;;  %v78_v55 = vmul.u32 2146121005, %v70_v44 }
  0x1e   :  { %v83_v56 = vshrl.u32 %v75_v48, 15  ;;  %v84_v57 = vshrl.u32 %v76_v49, 15  ;;  %v79_v58 = vmul.u32 2146121005, %v71_v50  ;;  %v80_v59 = vmul.u32 2146121005, %v72_v51 }
  0x1f   :  { %v89_v60 = vxor.u32 %v81_v52, %v73_v45  ;;  %v90_v61 = vxor.u32 %v82_v53, %v74_v46  ;;  %v85_v62 = vshrl.u32 %v77_v54, 15  ;;  %v86_v63 = vshrl.u32 %v78_v55, 15 }
  0x20   :  { %v91_v0 = vxor.u32 %v83_v56, %v75_v48  ;;  %v92_v2 = vxor.u32 %v84_v57, %v76_v49  ;;  %v87_v1 = vshrl.u32 %v79_v58, 15  ;;  %v88_v3 = vshrl.u32 %v80_v59, 15 }
  0x21   :  { %v97_v4 = vmul.u32 2221713035, %v89_v60  ;;  %v98_v5 = vmul.u32 2221713035, %v90_v61  ;;  %v93_v6 = vxor.u32 %v85_v62, %v77_v54  ;;  %v94_v7 = vxor.u32 %v86_v63, %v78_v55  ;;  %v145_v54 = vld [vmem:[#allocation4] sm:$0xff]  ;;  %v146_v61 = vld [vmem:[#allocation4 + $0x8] sm:$0xff] }
  0x22   :  { %v99_v8 = vmul.u32 2221713035, %v91_v0  ;;  %v100_v9 = vmul.u32 2221713035, %v92_v2  ;;  %v95_v10 = vxor.u32 %v87_v1, %v79_v58  ;;  %v96_v11 = vxor.u32 %v88_v3, %v80_v59 }
  0x23   :  { %v105_v12 = vshrl.u32 %v97_v4, 16  ;;  %v106_v13 = vshrl.u32 %v98_v5, 16  ;;  %v101_v14 = vmul.u32 2221713035, %v93_v6  ;;  %v102_v15 = vmul.u32 2221713035, %v94_v7 }
  0x24   :  { %v107_v16 = vshrl.u32 %v99_v8, 16  ;;  %v108_v17 = vshrl.u32 %v100_v9, 16  ;;  %v103_v18 = vmul.u32 2221713035, %v95_v10  ;;  %v104_v19 = vmul.u32 2221713035, %v96_v11 }
  0x25   :  { %v113_v20 = vxor.u32 %v105_v12, %v97_v4  ;;  %v114_v21 = vxor.u32 %v106_v13, %v98_v5  ;;  %v109_v22 = vshrl.u32 %v101_v14, 16  ;;  %v110_v23 = vshrl.u32 %v102_v15, 16 }
  0x26   :  { %v115_v24 = vxor.u32 %v107_v16, %v99_v8  ;;  %v116_v25 = vxor.u32 %v108_v17, %v100_v9  ;;  %v111_v26 = vshrl.u32 %v103_v18, 16  ;;  %v112_v27 = vshrl.u32 %v104_v19, 16 }
  0x27   :  { %v121_v28 = vshrl.u32 %v113_v20, 8  ;;  %v122_v29 = vshrl.u32 %v114_v21, 8  ;;  %v117_v30 = vxor.u32 %v109_v22, %v101_v14  ;;  %v118_v31 = vxor.u32 %v110_v23, %v102_v15 }
  0x28   :  { %v123_v32 = vshrl.u32 %v115_v24, 8  ;;  %v124_v33 = vshrl.u32 %v116_v25, 8  ;;  %v119_v34 = vxor.u32 %v111_v26, %v103_v18  ;;  %v120_v35 = vxor.u32 %v112_v27, %v104_v19 }
  0x29   :  { %vm129_vm0 = vcmp.lt.s32.totalorder %v121_v28, 5033165  ;;  %vm130_vm1 = vcmp.lt.s32.totalorder %v122_v29, 5033165  ;;  %v125_v36 = vshrl.u32 %v117_v30, 8  ;;  %v126_v37 = vshrl.u32 %v118_v31, 8 }
  0x2a   :  { %vm131_vm2 = vcmp.lt.s32.totalorder %v123_v32, 5033165  ;;  %vm132_vm3 = vcmp.lt.s32.totalorder %v124_v33, 5033165  ;;  %v137_v39 = vsel %vm129_vm0, 0.0, %v260_v38  ;;  %v138_v40 = vsel %vm130_vm1, 0.0, %v260_v38 }
  0x2b   :  { %v139_v41 = vsel %vm131_vm2, 0.0, %v260_v38  ;;  %v140_v42 = vsel %vm132_vm3, 0.0, %v260_v38  ;;  %v155_v43 = vcombine.low %v137_v39, %v138_v40  ;;  %v127_v44 = vshrl.u32 %v119_v34, 8 }
  0x2c   :  { %v156_v45 = vcombine.low %v139_v41, %v140_v42  ;;  %v128_v46 = vshrl.u32 %v120_v35, 8  ;;  %vm133_vm4 = vcmp.lt.s32.totalorder %v125_v36, 5033165  ;;  %vm134_vm5 = vcmp.lt.s32.totalorder %v126_v37, 5033165 }
  0x2d   :  { %v163_v48 = vrot.slane %v155_v43, %v283_v47  ;;  %vm135_vm6 = vcmp.lt.s32.totalorder %v127_v44, 5033165  ;;  %v141_v49 = vsel %vm133_vm4, 0.0, %v260_v38  ;;  %v142_v50 = vsel %vm134_vm5, 0.0, %v260_v38 }
  0x2e   :  { %v170_v51 = vrot.slane %v156_v45, %v283_v47  ;;  %vm136_vm7 = vcmp.lt.s32.totalorder %v128_v46, 5033165  ;;  %v143_v52 = vsel %vm135_vm6, 0.0, %v260_v38  ;;  %v172_v53 = vcombine.low %v141_v49, %v142_v50 }
  0x2f   :  { %v144_v55 = vsel %vm136_vm7, 0.0, %v260_v38 }
  0x30   :  { %v171_v56 = vcombine.low %v163_v48, %v170_v51  ;;  %v173_v57 = vcombine.low %v143_v52, %v144_v55  ;;  %v180_v58 = vrot.slane %v172_v53, %v283_v47 }
  0x32   :  { %v191_v59 = vmul.f32 %v171_v56, %v145_v54  ;;  %v187_v60 = vrot.slane %v173_v57, %v283_v47 }
  0x34   :  { %193 = vst [vmem:[#allocation7] sm:$0xff] %v191_v59  ;;  %v188_v62 = vcombine.low %v180_v58, %v187_v60 }
  0x36   :  { %v192_v63 = vmul.f32 %v188_v62, %v146_v61 }
  0x38   :  { %194 = vst [vmem:[#allocation7 + $0x8] sm:$0xff] %v192_v63 }
  0x39   :  { %245 = shalt.err (!%p242_p9)
}
  0x3a   :  { %204 = dma.vmem_to_hbm [thread:$0]  %s202_s1, 256, %s294_s2, [#allocation6]  }
  0x3b   :  { %256 = dma.done.wait [#allocation6], 256  }
  0x3c   :  { %257 = vsyncadd [#allocation6], 4294967040 }
  0x3d   :  { %208 = vsyncpa [#allocation5], 1 }
  0x3e   :  { %209 = vsyncpa [#allocation6], 1 }

</bundles_post_ra>
